<compile_context>
chip_gen: v7x
topology: tpu7x:2x2x1
jax: 0.10.0
libtpu: 0.0.40
codegen_flags: <defaults>
</compile_context>

<pallas_src>
import functools

import jax
import jax.numpy as jnp
from jax.experimental import pallas as pl
from jax.experimental.pallas import tpu as pltpu


def _attention_kernel(p_valid, enc_ref, dec_ref,
                      w_enc_ref, w_dec_ref, b_att_ref, w_full_ref,
                      awe_ref, alpha_ref):
    # enc_ref  : (TB, Pp, E)   dec_ref  : (TB, D)
    # w_enc    : (E, A)        w_dec    : (D, A)
    # b_att    : (1, A)   (= b_enc + b_dec, folded; f32)
    # w_full   : (1, A)   (row form of the PyTorch (A, 1) weight; f32)
    # awe_ref  : (TB, E)       alpha_ref: (TB, Pp)    (lane-dense f32)
    tb, Pp, E = enc_ref.shape
    A = w_enc_ref.shape[1]

    enc = enc_ref[...]                                    # (TB, Pp, E)
    enc2d = enc.reshape(tb * Pp, E)                       # free fold (Pp sublane-aligned)

    # encoder_att: one big (TB*Pp, E) @ (E, A) MXU matmul, f32 accumulation.
    att1 = jnp.dot(enc2d, w_enc_ref[...],
                   preferred_element_type=jnp.float32)                  # (TB*Pp, A)
    # decoder_att: (TB, D) @ (D, A); b_enc folded into b_att so the bias add is
    # done once on the small (TB, A) tensor, not broadcast over (TB*Pp, A).
    att2 = jnp.dot(dec_ref[...], w_dec_ref[...],
                   preferred_element_type=jnp.float32) + b_att_ref[...]  # (TB, A)

    # relu(att1 + att2.unsqueeze(1))
    h = jnp.maximum(att1.reshape(tb, Pp, A) + att2[:, None, :], 0.0)     # (TB, Pp, A)

    # full_att (A -> 1) as VPU multiply + XLU lane reduce -> lane-dense (TB, Pp).
    # b_full is a constant pre-softmax shift and cancels exactly in softmax.
    att = jnp.sum(h * w_full_ref[...], axis=-1)                          # (TB, Pp)

    if p_valid < Pp:  # static: mask padded pixels out of the softmax
        col = jax.lax.broadcasted_iota(jnp.int32, (tb, Pp), 1)
        att = jnp.where(col < p_valid, att, -1e30)

    # softmax over num_pixels (lane axis), max-stabilized; EUP reciprocal.
    m = jnp.max(att, axis=-1, keepdims=True)                             # (TB, 1)
    e = jnp.exp(att - m)
    alpha = e * pl.reciprocal(jnp.sum(e, axis=-1, keepdims=True), approx=True)

    # attention_weighted_encoding = sum_p alpha[b,p] * enc[b,p,:]
    # VPU weighted sum: broadcast alpha over the E lanes and reduce over P, so
    # the large (Pp, E) encoder slab never becomes an MXU weight operand.
    awe = jnp.sum(enc.astype(jnp.float32) * alpha[:, :, None], axis=1)   # (TB, E)

    awe_ref[...] = awe
    alpha_ref[...] = alpha


def _vmem_plan(B, Pp, E, D, A, in_itemsize, tb=None):
    """Pick the batch tile from a per-generation VMEM budget and size vmem_limit_bytes."""
    try:
        vmem_cap = int(pltpu.get_tpu_info().vmem_capacity_bytes)
    except Exception:
        vmem_cap = 64 * 1024 * 1024           # v7x-safe fallback (smallest VMEM)
    budget = int(vmem_cap * 0.6)              # headroom for compiler scratch / spills

    # Resident weights. The grid pipeline still double-buffers constant inputs,
    # so they are budgeted at 2x here.
    # TODO(synk): single-buffer the constant weight BlockSpecs with
    # pipeline_mode=pl.Buffered(1) once that path is validated on the target jax.
    weight_bytes = 2 * (E * A + D * A + 2 * A) * in_itemsize
    # Per-sample cost: double-buffered enc/dec tiles + f32 outputs + the large
    # f32 intermediates (att1, h, plus slack for fusion temporaries).
    per_sample = (2 * (Pp * E + D) * in_itemsize
                  + 2 * (E + Pp) * 4
                  + 3 * Pp * A * 4)
    target = max(1, (budget - weight_bytes) // per_sample)

    if tb is None:
        # Valid tiles: divisors of B that keep (tb, E)/(tb, Pp)/(tb, D) blocks
        # sublane-aligned (tb % 8 == 0) or cover the whole batch.
        cands = [d for d in range(1, B + 1)
                 if B % d == 0 and (d % 8 == 0 or d == B)]
        fitting = [d for d in cands if d <= target] or [min(cands)]
        tb = max(fitting)
        # Prefer >= 2 grid steps (pipelining + v7x megacore sharding) when that
        # costs at most a 2x smaller tile.
        smaller = [d for d in fitting if d < B]
        if tb == B and smaller and 2 * max(smaller) >= B:
            tb = max(smaller)

    needed = weight_bytes + tb * per_sample + (8 << 20)
    vmem_limit = int(min(max(needed, 32 << 20), int(vmem_cap * 0.9)))
    return tb, vmem_limit


def attention_forward(encoder_out, decoder_hidden, params, *,
                      compute_dtype=jnp.float32, tb=None):
    """Attention forward pass with a single Pallas TPU kernel.

    encoder_out:    (B, P, E) float32
    decoder_hidden: (B, D)    float32
    params: w_enc (E,A), b_enc (A,), w_dec (D,A), b_dec (A,), w_full (A,1), b_full (1,)
    compute_dtype: dtype fed to the MXU matmuls (bf16 halves HBM traffic and
                   boosts MXU throughput on v6e/v7x; softmax + weighted sum stay f32).
    returns: (attention_weighted_encoding (B, E), alpha (B, P)) in float32.
    """
    B, P, E = encoder_out.shape
    D = decoder_hidden.shape[1]
    A = params["w_enc"].shape[1]

    in_dtype = jnp.dtype(compute_dtype)
    # Pad num_pixels to a sublane multiple (8 for 4-byte, 16 for 2-byte dtypes).
    sub = 8 * (4 // in_dtype.itemsize)
    Pp = -(-P // sub) * sub

    enc = encoder_out
    if Pp != P:
        enc = jnp.pad(enc, ((0, 0), (0, Pp - P), (0, 0)))
    enc = enc.astype(in_dtype)
    dec = decoder_hidden.astype(in_dtype)
    w_enc = params["w_enc"].astype(in_dtype)
    w_dec = params["w_dec"].astype(in_dtype)
    # Fold b_enc into the decoder-side bias; drop b_full (cancels in softmax).
    b_att = (params["b_enc"] + params["b_dec"]).reshape(1, A).astype(jnp.float32)
    w_full_row = params["w_full"].reshape(1, A).astype(jnp.float32)

    tb, vmem_limit = _vmem_plan(B, Pp, E, D, A, in_dtype.itemsize, tb=tb)
    assert B % tb == 0, "batch must be divisible by the batch tile"

    awe, alpha = pl.pallas_call(
        functools.partial(_attention_kernel, P),
        out_shape=(
            jax.ShapeDtypeStruct((B, E), jnp.float32),
            jax.ShapeDtypeStruct((B, Pp), jnp.float32),
        ),
        grid_spec=pltpu.PrefetchScalarGridSpec(
            num_scalar_prefetch=0,
            grid=(B // tb,),
            in_specs=[
                pl.BlockSpec((tb, Pp, E), lambda b: (b, 0, 0)),   # encoder tile
                pl.BlockSpec((tb, D), lambda b: (b, 0)),          # decoder tile
                pl.BlockSpec((E, A), lambda b: (0, 0)),           # w_enc (resident)
                pl.BlockSpec((D, A), lambda b: (0, 0)),           # w_dec (resident)
                pl.BlockSpec((1, A), lambda b: (0, 0)),           # b_enc + b_dec
                pl.BlockSpec((1, A), lambda b: (0, 0)),           # w_full as a row
            ],
            out_specs=[
                pl.BlockSpec((tb, E), lambda b: (b, 0)),          # awe, lane-dense
                pl.BlockSpec((tb, Pp), lambda b: (b, 0)),         # alpha, lane-dense
            ],
        ),
        compiler_params=pltpu.CompilerParams(
            dimension_semantics=("parallel",),    # batch tiles are independent
            vmem_limit_bytes=vmem_limit,
        ),
    )(enc, dec, w_enc, w_dec, b_att, w_full_row)

    if Pp != P:
        alpha = alpha[:, :P]
    return awe, alpha


def _reference_forward(encoder_out, decoder_hidden, params):
    att1 = encoder_out @ params["w_enc"] + params["b_enc"]               # (B, P, A)
    att2 = decoder_hidden @ params["w_dec"] + params["b_dec"]            # (B, A)
    h = jnp.maximum(att1 + att2[:, None, :], 0.0)
    att = (h @ params["w_full"])[..., 0] + params["b_full"][0]           # (B, P)
    alpha = jax.nn.softmax(att, axis=1)
    awe = jnp.sum(encoder_out * alpha[:, :, None], axis=1)
    return awe, alpha


if __name__ == "__main__":
    # Small shapes consistent with the module; P=12 exercises the sublane-padding
    # + softmax-mask path (padded to 16), E/A are lane-aligned.
    B, P, E, D, A = 2, 12, 128, 64, 128

    key = jax.random.PRNGKey(0)
    k = jax.random.split(key, 8)
    encoder_out = jax.random.normal(k[0], (B, P, E), dtype=jnp.float32)
    decoder_hidden = jax.random.normal(k[1], (B, D), dtype=jnp.float32)

    params = {
        "w_enc": 0.1 * jax.random.normal(k[2], (E, A), dtype=jnp.float32),
        "b_enc": 0.1 * jax.random.normal(k[3], (A,), dtype=jnp.float32),
        "w_dec": 0.1 * jax.random.normal(k[4], (D, A), dtype=jnp.float32),
        "b_dec": 0.1 * jax.random.normal(k[5], (A,), dtype=jnp.float32),
        "w_full": 0.1 * jax.random.normal(k[6], (A, 1), dtype=jnp.float32),
        "b_full": 0.1 * jax.random.normal(k[7], (1,), dtype=jnp.float32),
    }

    awe_ref, alpha_ref = _reference_forward(encoder_out, decoder_hidden, params)

    # f32 matmul path (tight check; approx reciprocal is well within 1e-3).
    awe, alpha = attention_forward(encoder_out, decoder_hidden, params)
    jax.block_until_ready((awe, alpha))
    assert jnp.allclose(awe, awe_ref, atol=1e-3, rtol=1e-3), "awe mismatch (f32)"
    assert jnp.allclose(alpha, alpha_ref, atol=1e-3, rtol=1e-3), "alpha mismatch (f32)"

    # bf16 MXU path (f32 accumulation + f32 softmax/weighted-sum; loosened tolerance).
    awe_b, alpha_b = attention_forward(encoder_out, decoder_hidden, params,
                                       compute_dtype=jnp.bfloat16)
    jax.block_until_ready((awe_b, alpha_b))
    assert jnp.allclose(awe_b, awe_ref, atol=2e-2, rtol=2e-2), "awe mismatch (bf16)"
    assert jnp.allclose(alpha_b, alpha_ref, atol=2e-2, rtol=2e-2), "alpha mismatch (bf16)"

    print("KERNEL_OK")
</pallas_src>

<mosaic_0001>
module attributes {stable_mosaic.version = 11 : i64} {
  func.func @_attention_kernel(%arg0: i32, %arg1: memref<2x16x128xf32, #tpu.memory_space<vmem>>, %arg2: memref<2x64xf32, #tpu.memory_space<vmem>>, %arg3: memref<128x128xf32, #tpu.memory_space<vmem>>, %arg4: memref<64x128xf32, #tpu.memory_space<vmem>>, %arg5: memref<1x128xf32, #tpu.memory_space<vmem>>, %arg6: memref<1x128xf32, #tpu.memory_space<vmem>>, %arg7: memref<2x128xf32, #tpu.memory_space<vmem>>, %arg8: memref<2x16xf32, #tpu.memory_space<vmem>>) attributes {dimension_semantics = [#tpu.dimension_semantics<parallel>], iteration_bounds = array<i64: 1>, scalar_prefetch = 0 : i64, scratch_operands = 0 : i64, tpu.core_type = #tpu.core_type<tc>, window_params = [{transform_indices = @transform_0, window_bounds = array<i64: 2, 16, 128>}, {transform_indices = @transform_1, window_bounds = array<i64: 2, 64>}, {pipeline_mode = #tpu.pipeline_mode<synchronous>, transform_indices = @transform_2, window_bounds = array<i64: 128, 128>}, {pipeline_mode = #tpu.pipeline_mode<synchronous>, transform_indices = @transform_3, window_bounds = array<i64: 64, 128>}, {pipeline_mode = #tpu.pipeline_mode<synchronous>, transform_indices = @transform_4, window_bounds = array<i64: 1, 128>}, {pipeline_mode = #tpu.pipeline_mode<synchronous>, transform_indices = @transform_5, window_bounds = array<i64: 1, 128>}, {transform_indices = @transform_6, window_bounds = array<i64: 2, 128>}, {transform_indices = @transform_7, window_bounds = array<i64: 2, 16>}]} {
    %c0 = arith.constant 0 : index
    %c0_0 = arith.constant 0 : index
    %c0_1 = arith.constant 0 : index
    %0 = vector.load %arg1[%c0, %c0_0, %c0_1] : memref<2x16x128xf32, #tpu.memory_space<vmem>>, vector<2x16x128xf32>
    %1 = vector.shape_cast %0 : vector<2x16x128xf32> to vector<32x128xf32>
    %c0_2 = arith.constant 0 : index
    %c0_3 = arith.constant 0 : index
    %2 = vector.load %arg3[%c0_2, %c0_3] : memref<128x128xf32, #tpu.memory_space<vmem>>, vector<128x128xf32>
    %cst = arith.constant dense<0.000000e+00> : vector<32x128xf32>
    %3 = tpu.matmul %1, %2, %cst {dimension_numbers = #tpu.dot_dimension_numbers<[1], [0], [0], [1], [0, 0, 1, 1], [], []>} : vector<32x128xf32>, vector<128x128xf32>, vector<32x128xf32> -> vector<32x128xf32>
    %c0_4 = arith.constant 0 : index
    %c0_5 = arith.constant 0 : index
    %4 = vector.load %arg2[%c0_4, %c0_5] : memref<2x64xf32, #tpu.memory_space<vmem>>, vector<2x64xf32>
    %c0_6 = arith.constant 0 : index
    %c0_7 = arith.constant 0 : index
    %5 = vector.load %arg4[%c0_6, %c0_7] : memref<64x128xf32, #tpu.memory_space<vmem>>, vector<64x128xf32>
    %cst_8 = arith.constant dense<0.000000e+00> : vector<2x128xf32>
    %6 = tpu.matmul %4, %5, %cst_8 {dimension_numbers = #tpu.dot_dimension_numbers<[1], [0], [0], [1], [0, 0, 1, 1], [], []>} : vector<2x64xf32>, vector<64x128xf32>, vector<2x128xf32> -> vector<2x128xf32>
    %c0_9 = arith.constant 0 : index
    %c0_10 = arith.constant 0 : index
    %7 = vector.load %arg5[%c0_9, %c0_10] : memref<1x128xf32, #tpu.memory_space<vmem>>, vector<1x128xf32>
    %8 = vector.broadcast %7 : vector<1x128xf32> to vector<2x128xf32>
    %9 = arith.addf %6, %8 : vector<2x128xf32>
    %10 = vector.shape_cast %3 : vector<32x128xf32> to vector<2x16x128xf32>
    %11 = vector.shape_cast %9 : vector<2x128xf32> to vector<2x1x128xf32>
    %12 = vector.broadcast %11 : vector<2x1x128xf32> to vector<2x16x128xf32>
    %13 = arith.addf %10, %12 : vector<2x16x128xf32>
    %cst_11 = arith.constant 0.000000e+00 : f32
    %14 = vector.broadcast %cst_11 : f32 to vector<2x16x128xf32>
    %15 = arith.maximumf %13, %14 : vector<2x16x128xf32>
    %c0_12 = arith.constant 0 : index
    %c0_13 = arith.constant 0 : index
    %16 = vector.load %arg6[%c0_12, %c0_13] : memref<1x128xf32, #tpu.memory_space<vmem>>, vector<1x128xf32>
    %17 = vector.shape_cast %16 : vector<1x128xf32> to vector<1x1x128xf32>
    %18 = vector.broadcast %17 : vector<1x1x128xf32> to vector<2x16x128xf32>
    %19 = arith.mulf %15, %18 : vector<2x16x128xf32>
    %cst_14 = arith.constant dense<0.000000e+00> : vector<2x16xf32>
    %20 = vector.multi_reduction <add>, %19, %cst_14 [2] : vector<2x16x128xf32> to vector<2x16xf32>
    %21 = tpu.iota {dimensions = array<i32: 1>} : vector<2x16xi32>
    %c12_i32 = arith.constant 12 : i32
    %22 = vector.broadcast %c12_i32 : i32 to vector<2x16xi32>
    %23 = arith.cmpi slt, %21, %22 : vector<2x16xi32>
    %cst_15 = arith.constant -1.000000e+30 : f32
    %24 = vector.broadcast %cst_15 : f32 to vector<2x16xf32>
    %25 = arith.select %23, %20, %24 : vector<2x16xi1>, vector<2x16xf32>
    %cst_16 = arith.constant dense<0xFF800000> : vector<2xf32>
    %26 = vector.multi_reduction <maximumf>, %25, %cst_16 [1] : vector<2x16xf32> to vector<2xf32>
    %27 = vector.shape_cast %26 : vector<2xf32> to vector<2x1xf32>
    %28 = vector.broadcast %27 : vector<2x1xf32> to vector<2x16xf32>
    %29 = arith.subf %25, %28 : vector<2x16xf32>
    %30 = math.exp %29 : vector<2x16xf32>
    %cst_17 = arith.constant dense<0.000000e+00> : vector<2xf32>
    %31 = vector.multi_reduction <add>, %30, %cst_17 [1] : vector<2x16xf32> to vector<2xf32>
    %32 = vector.shape_cast %31 : vector<2xf32> to vector<2x1xf32>
    %33 = tpu.reciprocal %32 {approx = true} : vector<2x1xf32> -> vector<2x1xf32>
    %34 = vector.broadcast %33 : vector<2x1xf32> to vector<2x16xf32>
    %35 = arith.mulf %30, %34 : vector<2x16xf32>
    %36 = vector.shape_cast %35 : vector<2x16xf32> to vector<2x16x1xf32>
    %37 = vector.broadcast %36 : vector<2x16x1xf32> to vector<2x16x128xf32>
    %38 = arith.mulf %0, %37 : vector<2x16x128xf32>
    %cst_18 = arith.constant dense<0.000000e+00> : vector<2x128xf32>
    %39 = vector.multi_reduction <add>, %38, %cst_18 [1] : vector<2x16x128xf32> to vector<2x128xf32>
    %c0_19 = arith.constant 0 : index
    %c0_20 = arith.constant 0 : index
    %40 = vector.load %arg7[%c0_19, %c0_20] : memref<2x128xf32, #tpu.memory_space<vmem>>, vector<2x128xf32>
    tpu.vector_store %arg7[%c0_19, %c0_20], %39 {strides = array<i32>} : memref<2x128xf32, #tpu.memory_space<vmem>>, vector<2x128xf32>,
    %c0_21 = arith.constant 0 : index
    %c0_22 = arith.constant 0 : index
    %41 = vector.load %arg8[%c0_21, %c0_22] : memref<2x16xf32, #tpu.memory_space<vmem>>, vector<2x16xf32>
    tpu.vector_store %arg8[%c0_21, %c0_22], %35 {strides = array<i32>} : memref<2x16xf32, #tpu.memory_space<vmem>>, vector<2x16xf32>,
    return
  }
  func.func @transform_0(%arg0: i32) -> (i32, i32, i32) {
    %c0_i32 = arith.constant 0 : i32
    %c0_i32_0 = arith.constant 0 : i32
    %c0_i32_1 = arith.constant 0 : i32
    return %arg0, %c0_i32, %c0_i32_0 : i32, i32, i32
  }
  func.func @transform_1(%arg0: i32) -> (i32, i32) {
    %c0_i32 = arith.constant 0 : i32
    %c0_i32_0 = arith.constant 0 : i32
    return %arg0, %c0_i32 : i32, i32
  }
  func.func @transform_2(%arg0: i32) -> (i32, i32) {
    %c0_i32 = arith.constant 0 : i32
    %c0_i32_0 = arith.constant 0 : i32
    %c0_i32_1 = arith.constant 0 : i32
    return %c0_i32, %c0_i32_0 : i32, i32
  }
  func.func @transform_3(%arg0: i32) -> (i32, i32) {
    %c0_i32 = arith.constant 0 : i32
    %c0_i32_0 = arith.constant 0 : i32
    %c0_i32_1 = arith.constant 0 : i32
    return %c0_i32, %c0_i32_0 : i32, i32
  }
  func.func @transform_4(%arg0: i32) -> (i32, i32) {
    %c0_i32 = arith.constant 0 : i32
    %c0_i32_0 = arith.constant 0 : i32
    %c0_i32_1 = arith.constant 0 : i32
    return %c0_i32, %c0_i32_0 : i32, i32
  }
  func.func @transform_5(%arg0: i32) -> (i32, i32) {
    %c0_i32 = arith.constant 0 : i32
    %c0_i32_0 = arith.constant 0 : i32
    %c0_i32_1 = arith.constant 0 : i32
    return %c0_i32, %c0_i32_0 : i32, i32
  }
  func.func @transform_6(%arg0: i32) -> (i32, i32) {
    %c0_i32 = arith.constant 0 : i32
    %c0_i32_0 = arith.constant 0 : i32
    return %arg0, %c0_i32 : i32, i32
  }
  func.func @transform_7(%arg0: i32) -> (i32, i32) {
    %c0_i32 = arith.constant 0 : i32
    %c0_i32_0 = arith.constant 0 : i32
    return %arg0, %c0_i32 : i32, i32
  }
}

</mosaic_0001>

<bundles_post_ra>
// kernel: tpu_custom_call.1
= control target key start
LH: loop header
LB: loop body
LE: loop exit
PB: predicated region body
PF: predicated region fallthrough
CT: control target
= control target key end

     0   :  { %13 = vsyncpa [#allocation3], 0  ;;  %s872_s0 = inlined_call_operand.hbm [shape: f32[2,16,128], index: 0, kind: input, shape index: {}]   ;;  %s873_s1 = inlined_call_operand.vmem [shape: f32[2,64], index: 1, kind: input, shape index: {}]   ;;  %s874_s2 = inlined_call_operand.hbm [shape: f32[128,128], index: 2, kind: input, shape index: {}]   ;;  %s875_s3 = inlined_call_operand.hbm [shape: f32[64,128], index: 3, kind: input, shape index: {}]   ;;  %s876_s4 = inlined_call_operand.vmem [shape: f32[1,128], index: 4, kind: input, shape index: {}]   ;;  %s877_s5 = inlined_call_operand.vmem [shape: f32[1,128], index: 5, kind: input, shape index: {}]   ;;  %s878_s6 = inlined_call_operand.hbm [shape: f32[2,128], index: 6, kind: output, shape index: {0}]   ;;  %s879_s7 = inlined_call_operand.hbm [shape: f32[2,16], index: 7, kind: output, shape index: {1}]  }
   0x1   :  { %14 = vsyncpa [#allocation6], 0 }
   0x2   :  { %15 = vsyncpa [#allocation4], 0 }
   0x3   :  { %16 = vsyncpa [#allocation10], 0  ;;  %s708_s24 = smov [#allocation5]   ;;  %s709_s26 = smov [#allocation2]  }
   0x4   :  { %s36_s25 = sshll.u32 %s708_s24, 4  ;;  %s22_s27 = sshll.u32 %s709_s26, 4  ;;  %s37_s25 = int_to_ptr.vmem [resolvable:$true] %s36_s25  ;;  %s759_s27 = int_to_ptr.vmem [resolvable:$true] %s22_s27 }
   0x5   :  { %s590_s30 = scalar_lea.hbm %s874_s2, 2048 }
   0x6   :  { %p591_p0 = scmp.ne.s32.totalorder %s874_s2, %s590_s30  ;;  %p594_p1 = scmp.lt.u32.totalorder %s590_s30, %s874_s2 }
   0x8   :  { %p596_p2 = pnand %p594_p1, %p591_p0 }
   0xa   :  { %599 = shalt.err (!%p596_p2)
}
   0xb   :  { %s600_s12 = scalar_lea.vmem %s37_s25, 2048  ;;  %p605_p4 = scmp.lt.s32.totalorder %s37_s25, %s37_s25 }
   0xc   :  { %p601_p3 = scmp.ne.s32.totalorder %s37_s25, %s600_s12  ;;  %p606_p5 = scmp.lt.s32.totalorder %s600_s12, %s600_s12 }
   0xe   :  { %p607_p6 = por %p606_p5, %p605_p4 }
  0x10   :  { %p608_p7 = pnand %p607_p6, %p601_p3 }
  0x12   :  { %611 = shalt.err (!%p608_p7)
}
  0x13   :  { %s710_s13 = smov 128   ;;  %s711_s14 = smov 8  }
  0x14   :  { %42 = dma.hbm_to_vmem [thread:$0]  %s874_s2, 2048, %s37_s25, [#allocation6], %s710_s13, %s710_s13, %s711_s14  }
  0x15   :  { %s612_s19 = scalar_lea.hbm %s872_s0, 512 }
  0x16   :  { %p613_p8 = scmp.ne.s32.totalorder %s872_s0, %s612_s19  ;;  %p616_p9 = scmp.lt.u32.totalorder %s612_s19, %s872_s0 }
  0x18   :  { %p618_p10 = pnand %p616_p9, %p613_p8 }
  0x1a   :  { %621 = shalt.err (!%p618_p10)
}
  0x1b   :  { %s622_s24 = scalar_lea.vmem %s759_s27, 512  ;;  %p627_p12 = scmp.lt.s32.totalorder %s759_s27, %s759_s27 }
  0x1c   :  { %p623_p11 = scmp.ne.s32.totalorder %s759_s27, %s622_s24  ;;  %p628_p13 = scmp.lt.s32.totalorder %s622_s24, %s622_s24 }
  0x1e   :  { %p629_p0 = por %p628_p13, %p627_p12 }
  0x20   :  { %p630_p1 = pnand %p629_p0, %p623_p11 }
  0x22   :  { %633 = shalt.err (!%p630_p1)
}
  0x23   :  { %28 = dma.hbm_to_vmem [thread:$0]  %s872_s0, 512, %s759_s27, [#allocation3], %s710_s13, %s710_s13, %s711_s14  }
  0x24   :  { %s712_s26 = smov [#allocation7]   ;;  %s634_s8 = scalar_lea.hbm %s875_s3, 1024 }
  0x25   :  { %s48_s28 = sshll.u32 %s712_s26, 4  ;;  %p635_p2 = scmp.ne.s32.totalorder %s875_s3, %s634_s8  ;;  %s49_s28 = int_to_ptr.vmem [resolvable:$true] %s48_s28 }
  0x26   :  { %p638_p3 = scmp.lt.u32.totalorder %s634_s8, %s875_s3 }
  0x28   :  { %p640_p4 = pnand %p638_p3, %p635_p2 }
  0x2a   :  { %643 = shalt.err (!%p640_p4)
}
  0x2b   :  { %s644_s15 = scalar_lea.vmem %s49_s28, 1024  ;;  %p649_p6 = scmp.lt.s32.totalorder %s49_s28, %s49_s28 }
  0x2c   :  { %p645_p5 = scmp.ne.s32.totalorder %s49_s28, %s644_s15  ;;  %p650_p7 = scmp.lt.s32.totalorder %s644_s15, %s644_s15 }
  0x2e   :  { %p651_p8 = por %p650_p7, %p649_p6 }
  0x30   :  { %p652_p9 = pnand %p651_p8, %p645_p5 }
  0x32   :  { %655 = shalt.err (!%p652_p9)
}
  0x33   :  { %54 = dma.hbm_to_vmem [thread:$0]  %s875_s3, 1024, %s49_s28, [#allocation6], %s710_s13, %s710_s13, %s711_s14  }
  0x34   :  { %700 = dma.done.wait [#allocation3], 512  }
  0x35   :  { %701 = vsyncadd [#allocation3], 4294966784 }
  0x36   :  { %702 = dma.done.wait [#allocation6], 3072  }
  0x37   :  { %703 = vsyncadd [#allocation6], 4294964224  ;;  %v713_v0 = vmov 0.0|0.0   ;;  %vm714_vm0 = vmmov 0   ;;  %v715_v1 = vmov 0.0   ;;  %v72_v2 = vld [vmem:[#allocation5] sm:$0xff]  ;;  %v267_v45 = vlaneseq }
  0x38   :  { %563 = vmatprep.subr.bf16.mxu1 %v713_v0  ;;  %528 = vmatprep.mubr.msk.f32.mxu1 %vm714_vm0, %v715_v1  ;;  %v73_v3 = vld [vmem:[#allocation5 + $0x8] sm:$0xff]  ;;  %v74_v4 = vld [vmem:[#allocation5 + $0x10] sm:$0xff]  ;;  %v75_v6 = vld [vmem:[#allocation5 + $0x18] sm:$0xff]  ;;  %vm189_vm1 = vcmask 523264   ;;  %v716_v43 = vmov 1966171168  }
  0x39   :  { %v531_v5 = vpack.c.bf16 %v73_v3, %v72_v2  ;;  %v76_v7 = vld [vmem:[#allocation5 + $0x20] sm:$0xff]  ;;  %v535_v8 = vpack.c.bf16 %v75_v6, %v74_v4  ;;  %v77_v9 = vld [vmem:[#allocation5 + $0x28] sm:$0xff]  ;;  %v176_v13 = vld [vmem:[#allocation7 + $0x10] sm:$0xff]  ;;  %v265_v44 = vunpack.c.l.s4 %v716_v43  ;;  %v826_v47 = vshrl.u32 %v267_v45, 7 }
  0x3a   :  { %v174_v10 = vld [vmem:[#allocation7] sm:$0xff]  ;;  %v175_v11 = vld [vmem:[#allocation7 + $0x8] sm:$0xff]  ;;  %v177_v14 = vld [vmem:[#allocation7 + $0x18] sm:$0xff]  ;;  %v539_v15 = vpack.c.bf16 %v77_v9, %v76_v7  ;;  %vm339_vm2 = vcmask 130112   ;;  %vm350_vm3 = vcmask 1041409   ;;  %vm354_vm5 = vcmask 123904  }
  0x3b   :  { %532 = vmatprep.subr.bf16.mxu0 %v531_v5  ;;  %v564_v12 = vpack.c.bf16 %v175_v11, %v174_v10  ;;  %v78_v16 = vld [vmem:[#allocation5 + $0x30] sm:$0xff]  ;;  %v567_v17 = vpack.c.bf16 %v177_v14, %v176_v13  ;;  %v79_v18 = vld [vmem:[#allocation5 + $0x38] sm:$0xff]  ;;  %v178_v19 = vld [vmem:[#allocation7 + $0x20] sm:$0xff]  ;;  %v266_v46 = vunpack.c.0.s8 %v265_v44  ;;  %v288_v56 = vsub.s32 0, %v826_v47 }
  0x3c   :  { %534 = vmatpush3.bf16.msra.mxu0 %v531_v5  ;;  %v179_v20 = vld [vmem:[#allocation7 + $0x28] sm:$0xff]  ;;  %v811_v21 = vld [vmem:[#allocation2] sm:$0xff]  ;;  %v543_v22 = vpack.c.bf16 %v79_v18, %v78_v16  ;;  %v180_v26 = vld [vmem:[#allocation7 + $0x30] sm:$0xff]  ;;  %v324_v13 = vand.u32 127, %v267_v45  ;;  %v379_v43 = vsub.s32 1, %v826_v47 }
  0x3d   :  { %536 = vmatprep.subr.bf16.mxu0 %v535_v8  ;;  %565 = vmatpush3.bf16.msra.mxu1 %v564_v12  ;;  %v80_v23 = vld [vmem:[#allocation5 + $0x40] sm:$0xff]  ;;  %v570_v24 = vpack.c.bf16 %v179_v20, %v178_v19  ;;  %v81_v25 = vld [vmem:[#allocation5 + $0x48] sm:$0xff]  ;;  %v181_v27 = vld [vmem:[#allocation7 + $0x38] sm:$0xff]  ;;  %v269_v50 = vsub.s32 %v266_v46, %v826_v47 }
  0x3e   :  { %566 = vmatprep.subr.bf16.mxu1 %v713_v0  ;;  %506 = vmatprep.mubr.f32.mxu0 %v811_v21  ;;  %v547_v28 = vpack.c.bf16 %v81_v25, %v80_v23  ;;  %v573_v29 = vpack.c.bf16 %v181_v27, %v180_v26  ;;  %v82_v30 = vld [vmem:[#allocation5 + $0x50] sm:$0xff]  ;;  %v83_v31 = vld [vmem:[#allocation5 + $0x58] sm:$0xff]  ;;  %v173_v33 = vld [vmem:[%s873_s1] sm:$0x3]  ;;  %v334_v14 = vadd.s32 4294967288, %v324_v13  ;;  %v332_v19 = vsub.s32 %v324_v13, %v826_v47 }
  0x3f   :  { %v551_v32 = vpack.c.bf16 %v83_v31, %v82_v30  ;;  %v84_v34 = vld [vmem:[#allocation5 + $0x60] sm:$0xff]  ;;  %v85_v35 = vld [vmem:[#allocation5 + $0x68] sm:$0xff]  ;;  %v86_v37 = vld [vmem:[#allocation5 + $0x70] sm:$0xff]  ;;  %vm325_vm4 = vcmp.lt.s32.totalorder %v324_v13, 12 }
  0x40   :  { %538 = vmatpush3.bf16.msra.mxu0 %v535_v8  ;;  %v555_v36 = vpack.c.bf16 %v85_v35, %v84_v34  ;;  %v87_v38 = vld [vmem:[#allocation5 + $0x78] sm:$0xff]  ;;  %v817_v40 = vld [vmem:[#allocation2 + $0x8] sm:$0xff]  ;;  %v819_v41 = vld [vmem:[#allocation2 + $0x10] sm:$0xff]  ;;  %v337_v16 = vsub.s32 %v334_v14, %v826_v47 }
  0x41   :  { %540 = vmatprep.subr.bf16.mxu0 %v539_v15  ;;  %568 = vmatpush3.bf16.msra.mxu1 %v567_v17  ;;  %v559_v39 = vpack.c.bf16 %v87_v38, %v86_v37  ;;  %v823_v42 = vld [vmem:[#allocation2 + $0x18] sm:$0xff]  ;;  %v442_v48 = vld [vmem:[%s876_s4] ss:$0 sm:$0xff]  ;;  %s717_s4 = smov [#allocation9]  }
  0x42   :  { %569 = vmatprep.subr.bf16.mxu1 %v713_v0 }
  0x44   :  { %542 = vmatpush3.bf16.msra.mxu0 %v539_v15 }
  0x45   :  { %544 = vmatprep.subr.bf16.mxu0 %v543_v22  ;;  %571 = vmatpush3.bf16.msra.mxu1 %v570_v24 }
  0x46   :  { %572 = vmatprep.subr.bf16.mxu1 %v713_v0  ;;  %v444_v0 = vld [vmem:[%s877_s5] ss:$0 sm:$0xff]  ;;  %s428_s5 = sshll.u32 %s717_s4, 4  ;;  %s429_s5 = int_to_ptr.vmem [resolvable:$true] %s428_s5 }
  0x47   :  { %s656_s18 = scalar_lea.vmem %s429_s5, 32  ;;  %p661_p11 = scmp.lt.s32.totalorder %s429_s5, %s429_s5 }
  0x48   :  { %546 = vmatpush3.bf16.msra.mxu0 %v543_v22  ;;  %p657_p10 = scmp.ne.s32.totalorder %s429_s5, %s656_s18  ;;  %p662_p12 = scmp.lt.s32.totalorder %s656_s18, %s656_s18 }
  0x49   :  { %548 = vmatprep.subr.bf16.mxu0 %v547_v28  ;;  %574 = vmatpush3.bf16.msra.mxu1 %v573_v29 }
  0x4a   :  { %p663_p13 = por %p662_p12, %p661_p11 }
  0x4c   :  { %550 = vmatpush3.bf16.msra.mxu0 %v547_v28  ;;  %529 = vmatmul.mubr.msk.f32.vlgmr.msra.gmra.mrb[0].mxu1 %vm189_vm1, %v173_v33  ;;  %p664_p0 = pnand %p663_p13, %p657_p10 }
  0x4d   :  { %552 = vmatprep.subr.bf16.mxu0 %v551_v32 }
  0x50   :  { %554 = vmatpush3.bf16.msra.mxu0 %v551_v32 }
  0x51   :  { %556 = vmatprep.subr.bf16.mxu0 %v555_v36 }
  0x54   :  { %558 = vmatpush3.bf16.msra.mxu0 %v555_v36 }
  0x55   :  { %560 = vmatprep.subr.bf16.mxu0 %v559_v39 }
  0x58   :  { %562 = vmatpush3.bf16.msra.mxu0 %v559_v39 }
  0x5b   :  { %507 = vmatmul.mubr.f32.vlgmr.msra.gmra.mrb[0].mxu0 %v817_v40 }
  0x5c   :  { %509 = vmatprep.mubr.f32.mxu0 %v819_v41 }
  0x5f   :  { %510 = vmatmul.mubr.f32.gmra.mrb[2].mxu0 %v823_v42 }
 0x11f   :  { %v259_v49 = vpop.f32.mrb[0].mxu1 }
 0x120   :  { %v260_v51 = vadd.f32 %v442_v48, %v259_v49  ;;  %v530_v52 = vpop.f32.mrb[1].mxu1 }
 0x122   :  { %v270_v53 = vrot.slane %v260_v51, %v269_v50 }
 0x124   :  { %v271_v54 = vcombine.high %v270_v53, %v270_v53  ;;  %v278_v55 = vrot.slane %v270_v53, %v269_v50 }
 0x126   :  { %v289_v57 = vrot.slane %v278_v55, %v288_v56  ;;  %v285_v58 = vrot.slane %v271_v54, %v269_v50 }
 0x128   :  { %v293_v62 = vrot.slane %v285_v58, %v288_v56 }
 0x12e   :  { %v508_v59 = vpop.f32.mrb[0].mxu0 }
 0x12f   :  { %v297_v60 = vadd.f32 %v508_v59, %v289_v57  ;;  %v154_v61 = vpop.f32.mrb[1].mxu0 }
 0x130   :  { %v296_v63 = vadd.f32 %v289_v57, %v154_v61 }
 0x131   :  { %v301_v5 = vmax.f32 %v297_v60, 0.0 }
 0x132   :  { %v300_v1 = vmax.f32 %v296_v63, 0.0  ;;  %v511_v2 = vpop.f32.mrb[2].mxu0 }
 0x133   :  { %v299_v3 = vadd.f32 %v511_v2, %v293_v62  ;;  %v164_v4 = vpop.f32.mrb[3].mxu0  ;;  %v312_v10 = vmul.f32 %v444_v0, %v301_v5 }
 0x134   :  { %v298_v6 = vadd.f32 %v293_v62, %v164_v4  ;;  %v311_v7 = vmul.f32 %v444_v0, %v300_v1 }
 0x135   :  { %v303_v9 = vmax.f32 %v299_v3, 0.0 }
 0x136   :  { %v302_v8 = vmax.f32 %v298_v6, 0.0  ;;  %315 = vadd.xlane.f32.xlu0 %v311_v7 }
 0x137   :  { %v314_v12 = vmul.f32 %v444_v0, %v303_v9 }
 0x138   :  { %v313_v11 = vmul.f32 %v444_v0, %v302_v8 }
 0x13a   :  { %317 = vadd.xlane.f32.xlu0 %v312_v10  ;;  %319 = vadd.xlane.f32.xlu1 %v313_v11 }
 0x13e   :  { %321 = vadd.xlane.f32.xlu1 %v314_v12 }
 0x1c3   :  { %v316_v15 = vpop.xlane.xlu0 %315 }
 0x1c4   :  { %v333_v23 = vrot.slane %v316_v15, %v332_v19 }
 0x1c7   :  { %v318_v17 = vpop.xlane.xlu0 %317  ;;  %v320_v18 = vpop.xlane.xlu1 %319 }
 0x1c8   :  { %v338_v20 = vrot.slane %v318_v17, %v337_v16  ;;  %v344_v24 = vrot.slane %v320_v18, %v332_v19 }
 0x1ca   :  { %v340_v26 = vsel %vm339_vm2, %v338_v20, %v333_v23 }
 0x1cb   :  { %v322_v22 = vpop.xlane.xlu1 %321 }
 0x1cc   :  { %v348_v25 = vrot.slane %v322_v22, %v337_v16 }
 0x1ce   :  { %v349_v27 = vsel %vm339_vm2, %v348_v25, %v344_v24 }
 0x1cf   :  { %v351_v28 = vsel %vm350_vm3, %v349_v27, %v340_v26 }
 0x1d0   :  { %v353_v29 = vsel %vm325_vm4, %v351_v28, -1e+30 }
 0x1d1   :  { %v355_v30 = vsel %vm354_vm5, %v353_v29, -inf }
 0x1d2   :  { %356 = vmax.xlane.f32.xlu0 %v355_v30 }
 0x25f   :  { %v357_v31 = vpop.xlane.xlu0 %356 }
 0x260   :  { %v358_v32 = vsub.f32 %v353_v29, %v357_v31 }
 0x262   :  { %v359_v33 = vmul.f32 1.442695, %v358_v32 }
 0x264   :  { %586 = vpow2.f32 %v359_v33 }
 0x26e   :  { %v587_v34 = vpop.eup %586 }
 0x26f   :  { %v361_v35 = vsel %vm354_vm5, %v587_v34, 0.0 }
 0x270   :  { %362 = vadd.xlane.f32.xlu1 %v361_v35 }
 0x2fd   :  { %v363_v36 = vpop.xlane.xlu1 %362 }
 0x2fe   :  { %588 = vrcp.f32 %v363_v36 }
 0x308   :  { %v589_v37 = vpop.eup %588 }
 0x309   :  { %v365_v38 = vmul.f32 %v589_v37, %v587_v34 }
 0x30b   :  { %v369_v39 = vrot.slane %v365_v38, %v288_v56  ;;  %411 = vst.msk [vmem:[#allocation9] sm:$0x3] %vm354_vm5, %v365_v38  ;;  %v380_v44 = vrot.slane %v365_v38, %v379_v43 }
 0x30d   :  { %375 = vbcast.lane.b32.xlu1 %v369_v39, 264  ;;  %371 = vbcast.lane.b32.xlu0 %v369_v39, 256 }
 0x311   :  { %382 = vbcast.lane.b32.xlu1 %v380_v44, 256 }
 0x315   :  { %386 = vbcast.lane.b32.xlu1 %v380_v44, 264 }
 0x316   :  { %667 = shalt.err (!%p664_p0)
}
 0x317   :  { %s668_s21 = scalar_lea.hbm %s879_s7, 32 }
 0x318   :  { %p669_p1 = scmp.ne.s32.totalorder %s879_s7, %s668_s21  ;;  %p672_p2 = scmp.lt.u32.totalorder %s668_s21, %s879_s7 }
 0x31a   :  { %p674_p3 = pnand %p672_p2, %p669_p1 }
 0x31c   :  { %677 = shalt.err (!%p674_p3)
}
 0x31d   :  { %431 = dma.vmem_to_hbm [thread:$0]  %s429_s5, 32, %s879_s7, [#allocation10]  }
 0x31e   :  { %s718_s7 = smov [#allocation8]  }
 0x31f   :  { %s418_s28 = sshll.u32 %s718_s7, 4  ;;  %s419_s28 = int_to_ptr.vmem [resolvable:$true] %s418_s28 }
 0x320   :  { %s678_s29 = scalar_lea.vmem %s419_s28, 32  ;;  %p683_p5 = scmp.lt.s32.totalorder %s419_s28, %s419_s28 }
 0x321   :  { %p679_p4 = scmp.ne.s32.totalorder %s419_s28, %s678_s29  ;;  %p684_p6 = scmp.lt.s32.totalorder %s678_s29, %s678_s29 }
 0x323   :  { %p685_p7 = por %p684_p6, %p683_p5 }
 0x325   :  { %p686_p8 = pnand %p685_p7, %p679_p4 }
 0x37f   :  { %v376_v45 = vpop.permute.xlu1 %375  ;;  %v372_v46 = vpop.permute.xlu0 %371 }
 0x380   :  { %v389_v47 = vmul.f32 %v376_v45, %v817_v40  ;;  %v388_v48 = vmul.f32 %v372_v46, %v811_v21 }
 0x382   :  { %v392_v49 = vadd.f32 %v389_v47, %v388_v48 }
 0x383   :  { %v383_v50 = vpop.permute.xlu1 %382 }
 0x384   :  { %v393_v51 = vrot.slane %v392_v49, 4  ;;  %v390_v54 = vmul.f32 %v383_v50, %v819_v41 }
 0x386   :  { %v394_v52 = vadd.f32 %v393_v51, %v392_v49 }
 0x387   :  { %v387_v53 = vpop.permute.xlu1 %386 }
 0x388   :  { %v391_v55 = vmul.f32 %v387_v53, %v823_v42  ;;  %v395_v56 = vrot.slane %v394_v52, 2 }
 0x38a   :  { %v399_v57 = vadd.f32 %v391_v55, %v390_v54  ;;  %v396_v59 = vadd.f32 %v395_v56, %v394_v52 }
 0x38c   :  { %v400_v58 = vrot.slane %v399_v57, 4  ;;  %v397_v62 = vrot.slane %v396_v59, 1 }
 0x38e   :  { %v401_v60 = vadd.f32 %v400_v58, %v399_v57  ;;  %v398_v21 = vadd.f32 %v397_v62, %v396_v59 }
 0x390   :  { %v402_v61 = vrot.slane %v401_v60, 2 }
 0x392   :  { %v403_v63 = vadd.f32 %v402_v61, %v401_v60 }
 0x394   :  { %v404_v40 = vrot.slane %v403_v63, 1 }
 0x396   :  { %v405_v0 = vadd.f32 %v404_v40, %v403_v63 }
 0x398   :  { %v408_v1 = vsel %vm350_vm3, %v405_v0, %v398_v21 }
 0x399   :  { %410 = vst [vmem:[#allocation8] sm:$0x3] %v408_v1 }
 0x39a   :  { %689 = shalt.err (!%p686_p8)
}
 0x39b   :  { %s690_s9 = scalar_lea.hbm %s878_s6, 32 }
 0x39c   :  { %p691_p9 = scmp.ne.s32.totalorder %s878_s6, %s690_s9  ;;  %p694_p10 = scmp.lt.u32.totalorder %s690_s9, %s878_s6 }
 0x39e   :  { %p696_p11 = pnand %p694_p10, %p691_p9 }
 0x3a0   :  { %699 = shalt.err (!%p696_p11)
}
 0x3a1   :  { %421 = dma.vmem_to_hbm [thread:$0]  %s419_s28, 32, %s878_s6, [#allocation4]  }
 0x3a2   :  { %704 = dma.done.wait [#allocation4], 32  }
 0x3a3   :  { %705 = vsyncadd [#allocation4], 4294967264 }
 0x3a4   :  { %706 = dma.done.wait [#allocation10], 32  }
 0x3a5   :  { %707 = vsyncadd [#allocation10], 4294967264 }
 0x3a6   :  { %438 = vsyncpa [#allocation3], 1 }
 0x3a7   :  { %439 = vsyncpa [#allocation6], 1 }
 0x3a8   :  { %440 = vsyncpa [#allocation4], 1 }
 0x3a9   :  { %441 = vsyncpa [#allocation10], 1 }

</bundles_post_ra>
